<compile_context>
chip_gen: v5e
topology: v5e:2x2
jax: 0.10.0
libtpu: 0.0.40
codegen_flags: <defaults>
</compile_context>

<pallas_src>
import functools

import jax
import jax.numpy as jnp
from jax.experimental import pallas as pl
from jax.experimental.pallas import tpu as pltpu

_LANE = 128
_SUBLANE = 8


def _round_up(x: int, m: int) -> int:
    return (x + m - 1) // m * m


def _fused_mlp_kernel(x_ref, *rest, num_layers: int, sigmoid_output: bool):
    """Fused MLP over one M-tile.

    x_ref : [tm, in_dim]                      (true, un-padded input width)
    rest  : (w0, b0, ..., w_{L-1}, b_{L-1}, o_ref)
            w_i: [K_i, N_i]   b_i: [1, N_i] (f32)   o_ref: [tm, out_dim]
    """
    o_ref = rest[-1]
    wb = rest[:-1]
    h = x_ref[...]
    for li in range(num_layers):
        w = wb[2 * li][...]
        b = wb[2 * li + 1][...]            # bias kept in f32 end-to-end
        # MXU matmul with f32 accumulation; only operands use compute dtype.
        y = jnp.dot(h.astype(w.dtype), w, preferred_element_type=jnp.float32)
        y = y + b
        if li < num_layers - 1:
            y = jnp.maximum(y, 0.0)        # ReLU on hidden layers
        h = y
    if sigmoid_output:
        h = jax.nn.sigmoid(h)
    o_ref[...] = h.astype(o_ref.dtype)


def _vmem_bytes(tm, pdims, x_isz, w_isz, out_isz):
    est = 2 * tm * pdims[0] * x_isz          # double-buffered streamed x tile
    est += 2 * tm * pdims[-1] * out_isz      # double-buffered streamed out tile
    for k, n in zip(pdims[:-1], pdims[1:]):
        est += 2 * k * n * w_isz + 2 * n * 4  # resident weights + f32 biases
    est += 2 * tm * max(pdims) * 4           # f32 intermediate activations
    return est


def prepare_mlp_params(params, compute_dtype=None):
    """Pad / cast weights ONCE (not per forward call).

    params: list of (W [in, out], b [1, out]) per layer (W transposed vs nn.Linear).
    Only hidden feature dims are zero-padded to 128 lanes; the true input and
    output dims are kept (x / out stream un-padded).  Biases stay f32.
    """
    num_layers = len(params)
    dims = [params[0][0].shape[0]] + [w.shape[1] for (w, _) in params]
    pdims = ([dims[0]]
             + [_round_up(d, _LANE) for d in dims[1:-1]]
             + [dims[-1]])
    w_dtype = (jnp.dtype(compute_dtype) if compute_dtype is not None
               else jnp.dtype(params[0][0].dtype))
    padded = []
    for li, (w, b) in enumerate(params):
        k, n = w.shape
        w_p = jnp.pad(w, ((0, pdims[li] - k), (0, pdims[li + 1] - n))).astype(w_dtype)
        b_p = jnp.pad(jnp.reshape(b, (1, n)),
                      ((0, 0), (0, pdims[li + 1] - n))).astype(jnp.float32)
        padded += [w_p, b_p]
    return {"padded": tuple(padded), "dims": tuple(dims), "pdims": tuple(pdims),
            "num_layers": num_layers, "w_dtype": w_dtype}


def mlp_forward(x, prepared, sigmoid_output: bool = False, *,
                tm_max: int = 1024, target_grid_steps: int = 4):
    """Forward pass equivalent to the PyTorch MLP.forward.

    x: [..., input_dim] -> [..., output_dim]
    prepared: result of prepare_mlp_params (weights already padded / cast).
    """
    num_layers = prepared["num_layers"]
    dims, pdims = prepared["dims"], prepared["pdims"]
    padded = prepared["padded"]
    in_dim, out_dim = dims[0], dims[-1]
    assert x.shape[-1] == in_dim, (x.shape, in_dim)

    lead_shape = x.shape[:-1]
    out_dtype = x.dtype
    x2d = x.reshape(-1, in_dim)
    M = x2d.shape[0]

    x_isz = jnp.dtype(x2d.dtype).itemsize
    w_isz = jnp.dtype(prepared["w_dtype"]).itemsize
    out_isz = jnp.dtype(out_dtype).itemsize

    # --- generation-aware VMEM budget (v7x: 64 MiB, v5e/v6e: 128 MiB) ---
    try:
        vmem_cap = int(pltpu.get_tpu_info().vmem_capacity_bytes)
    except Exception:
        vmem_cap = 64 << 20  # conservative (v7x-sized) fallback
    budget = int(0.6 * vmem_cap)

    # Fallback when the resident weight set cannot fit even with tm=8.
    if _vmem_bytes(_SUBLANE, pdims, x_isz, w_isz, out_isz) > budget:
        # TODO(synk): stream weight tiles (extra "arbitrary" grid axis or
        # pltpu.emit_pipeline) instead of dropping out of Pallas for huge MLPs.
        h = x2d
        for li in range(num_layers):
            w, b = padded[2 * li], padded[2 * li + 1]
            h = jnp.dot(h.astype(w.dtype), w,
                        preferred_element_type=jnp.float32) + b
            if li < num_layers - 1:
                h = jnp.maximum(h, 0.0)
        if sigmoid_output:
            h = jax.nn.sigmoid(h)
        return h.astype(out_dtype).reshape(*lead_shape, out_dim)

    # --- pick tm: >= target_grid_steps grid steps (megacore + pipelining),
    #     capped by tm_max and the VMEM budget ---
    tm = _round_up(max(1, pl.cdiv(M, max(1, target_grid_steps))), _SUBLANE)
    tm = max(_SUBLANE, min(tm, _round_up(tm_max, _SUBLANE)))
    while tm > _SUBLANE and _vmem_bytes(tm, pdims, x_isz, w_isz, out_isz) > budget:
        tm = max(_SUBLANE, _round_up(tm // 2, _SUBLANE))
    grid = (pl.cdiv(M, tm),)

    # x / out stream un-padded (block last dim == full array dim); weights and
    # biases use constant index_maps so they are fetched once and stay resident.
    in_specs = [pl.BlockSpec((tm, in_dim), lambda i: (i, 0))]
    for li in range(num_layers):
        in_specs.append(pl.BlockSpec((pdims[li], pdims[li + 1]), lambda i: (0, 0)))
        in_specs.append(pl.BlockSpec((1, pdims[li + 1]), lambda i: (0, 0)))
    out_spec = pl.BlockSpec((tm, out_dim), lambda i: (i, 0))

    flops = sum(2 * M * pdims[li] * pdims[li + 1] for li in range(num_layers))
    transcendentals = M * out_dim if sigmoid_output else 0
    bytes_accessed = (x2d.size * x_isz
                      + sum(p.size * p.dtype.itemsize for p in padded)
                      + M * out_dim * out_isz)

    vmem_need = _vmem_bytes(tm, pdims, x_isz, w_isz, out_isz)
    vmem_limit = int(min(max(vmem_need + (4 << 20), 32 << 20),
                         int(0.75 * vmem_cap)))

    kernel = functools.partial(_fused_mlp_kernel,
                               num_layers=num_layers,
                               sigmoid_output=sigmoid_output)

    out = pl.pallas_call(
        kernel,
        out_shape=jax.ShapeDtypeStruct((M, out_dim), out_dtype),
        grid=grid,
        in_specs=in_specs,
        out_specs=out_spec,
        compiler_params=pltpu.CompilerParams(
            dimension_semantics=("parallel",),
            vmem_limit_bytes=vmem_limit),
        cost_estimate=pl.CostEstimate(
            flops=flops,
            transcendentals=transcendentals,
            bytes_accessed=bytes_accessed),
    )(x2d, *padded)

    return out.reshape(*lead_shape, out_dim)


def init_mlp_params(key, input_dim, hidden_dim, output_dim, num_layers,
                    dtype=jnp.float32):
    """Deterministic init matching nn.Linear shapes. Returns [(W [in,out], b [1,out])]."""
    h = [hidden_dim] * (num_layers - 1)
    dims_in = [input_dim] + h
    dims_out = h + [output_dim]
    params = []
    for n_in, n_out in zip(dims_in, dims_out):
        key, kw, kb = jax.random.split(key, 3)
        bound = 1.0 / (n_in ** 0.5)
        W = jax.random.uniform(kw, (n_in, n_out), dtype, -bound, bound)
        b = jax.random.uniform(kb, (1, n_out), dtype, -bound, bound)
        params.append((W, b))
    return params


def mlp_forward_ref(x, params, sigmoid_output: bool = False):
    """Pure-JAX reference for correctness checking."""
    num_layers = len(params)
    for i, (W, b) in enumerate(params):
        x = jnp.dot(x, W) + b[0]
        if i < num_layers - 1:
            x = jax.nn.relu(x)
    if sigmoid_output:
        x = jax.nn.sigmoid(x)
    return x


if __name__ == "__main__":
    key = jax.random.PRNGKey(0)
    kx, kp, kx2 = jax.random.split(key, 3)

    # SAM mask-decoder-style MLP: input_dim=32, hidden_dim=32, output_dim=16, 3 layers.
    batch, seq, input_dim, hidden_dim, output_dim, num_layers = 2, 8, 32, 32, 16, 3
    sigmoid_output = True

    x = jax.random.normal(kx, (batch, seq, input_dim), jnp.float32)
    params = init_mlp_params(kp, input_dim, hidden_dim, output_dim, num_layers)
    ref = mlp_forward_ref(x, params, sigmoid_output=sigmoid_output)

    # Prepare (pad + cast) weights ONCE — not inside the forward call.
    prepared_f32 = prepare_mlp_params(params)

    # f32 path: strict check against the pure-JAX reference.
    out = jax.block_until_ready(
        mlp_forward(x, prepared_f32, sigmoid_output=sigmoid_output))
    assert out.shape == (batch, seq, output_dim), out.shape
    assert jnp.allclose(out, ref, atol=1e-5, rtol=1e-5), "f32 mismatch vs reference"

    # Ragged M (=21, not a multiple of the tile) exercises partial-block handling.
    x_ragged = jax.random.normal(kx2, (3, 7, input_dim), jnp.float32)
    ref_ragged = mlp_forward_ref(x_ragged, params, sigmoid_output=sigmoid_output)
    out_ragged = jax.block_until_ready(
        mlp_forward(x_ragged, prepared_f32, sigmoid_output=sigmoid_output))
    assert out_ragged.shape == (3, 7, output_dim), out_ragged.shape
    assert jnp.allclose(out_ragged, ref_ragged, atol=1e-5, rtol=1e-5), \
        "f32 ragged-M mismatch vs reference"

    # bf16 MXU-operand path (f32 accumulation / epilogue, f32 biases): loose check.
    prepared_bf16 = prepare_mlp_params(params, compute_dtype=jnp.bfloat16)
    out_bf16 = jax.block_until_ready(
        mlp_forward(x, prepared_bf16, sigmoid_output=sigmoid_output))
    assert out_bf16.shape == (batch, seq, output_dim), out_bf16.shape
    assert jnp.allclose(out_bf16, ref, atol=5e-2, rtol=5e-2), "bf16 mismatch vs reference"

    print("KERNEL_OK")
</pallas_src>

<mosaic_0001>
module attributes {stable_mosaic.version = 11 : i64} {
  func.func @_fused_mlp_kernel(%arg0: i32, %arg1: memref<8x32xf32, #tpu.memory_space<vmem>>, %arg2: memref<32x128xf32, #tpu.memory_space<vmem>>, %arg3: memref<1x128xf32, #tpu.memory_space<vmem>>, %arg4: memref<128x128xf32, #tpu.memory_space<vmem>>, %arg5: memref<1x128xf32, #tpu.memory_space<vmem>>, %arg6: memref<128x16xf32, #tpu.memory_space<vmem>>, %arg7: memref<1x16xf32, #tpu.memory_space<vmem>>, %arg8: memref<8x16xf32, #tpu.memory_space<vmem>>) attributes {dimension_semantics = [#tpu.dimension_semantics<parallel>], iteration_bounds = array<i64: 2>, scalar_prefetch = 0 : i64, scratch_operands = 0 : i64, tpu.core_type = #tpu.core_type<tc>, window_params = [{transform_indices = @transform_0, window_bounds = array<i64: 8, 32>}, {pipeline_mode = #tpu.pipeline_mode<synchronous>, transform_indices = @transform_1, window_bounds = array<i64: 32, 128>}, {pipeline_mode = #tpu.pipeline_mode<synchronous>, transform_indices = @transform_2, window_bounds = array<i64: 1, 128>}, {pipeline_mode = #tpu.pipeline_mode<synchronous>, transform_indices = @transform_3, window_bounds = array<i64: 128, 128>}, {pipeline_mode = #tpu.pipeline_mode<synchronous>, transform_indices = @transform_4, window_bounds = array<i64: 1, 128>}, {pipeline_mode = #tpu.pipeline_mode<synchronous>, transform_indices = @transform_5, window_bounds = array<i64: 128, 16>}, {pipeline_mode = #tpu.pipeline_mode<synchronous>, transform_indices = @transform_6, window_bounds = array<i64: 1, 16>}, {transform_indices = @transform_7, window_bounds = array<i64: 8, 16>}]} {
    %c0 = arith.constant 0 : index
    %c0_0 = arith.constant 0 : index
    %0 = vector.load %arg1[%c0, %c0_0] : memref<8x32xf32, #tpu.memory_space<vmem>>, vector<8x32xf32>
    %c0_1 = arith.constant 0 : index
    %c0_2 = arith.constant 0 : index
    %1 = vector.load %arg2[%c0_1, %c0_2] : memref<32x128xf32, #tpu.memory_space<vmem>>, vector<32x128xf32>
    %c0_3 = arith.constant 0 : index
    %c0_4 = arith.constant 0 : index
    %2 = vector.load %arg3[%c0_3, %c0_4] : memref<1x128xf32, #tpu.memory_space<vmem>>, vector<1x128xf32>
    %cst = arith.constant dense<0.000000e+00> : vector<8x128xf32>
    %3 = tpu.matmul %0, %1, %cst {dimension_numbers = #tpu.dot_dimension_numbers<[1], [0], [0], [1], [0, 0, 1, 1], [], []>} : vector<8x32xf32>, vector<32x128xf32>, vector<8x128xf32> -> vector<8x128xf32>
    %4 = vector.broadcast %2 : vector<1x128xf32> to vector<8x128xf32>
    %5 = arith.addf %3, %4 : vector<8x128xf32>
    %cst_5 = arith.constant 0.000000e+00 : f32
    %6 = vector.broadcast %cst_5 : f32 to vector<8x128xf32>
    %7 = arith.maximumf %5, %6 : vector<8x128xf32>
    %c0_6 = arith.constant 0 : index
    %c0_7 = arith.constant 0 : index
    %8 = vector.load %arg4[%c0_6, %c0_7] : memref<128x128xf32, #tpu.memory_space<vmem>>, vector<128x128xf32>
    %c0_8 = arith.constant 0 : index
    %c0_9 = arith.constant 0 : index
    %9 = vector.load %arg5[%c0_8, %c0_9] : memref<1x128xf32, #tpu.memory_space<vmem>>, vector<1x128xf32>
    %cst_10 = arith.constant dense<0.000000e+00> : vector<8x128xf32>
    %10 = tpu.matmul %7, %8, %cst_10 {dimension_numbers = #tpu.dot_dimension_numbers<[1], [0], [0], [1], [0, 0, 1, 1], [], []>} : vector<8x128xf32>, vector<128x128xf32>, vector<8x128xf32> -> vector<8x128xf32>
    %11 = vector.broadcast %9 : vector<1x128xf32> to vector<8x128xf32>
    %12 = arith.addf %10, %11 : vector<8x128xf32>
    %cst_11 = arith.constant 0.000000e+00 : f32
    %13 = vector.broadcast %cst_11 : f32 to vector<8x128xf32>
    %14 = arith.maximumf %12, %13 : vector<8x128xf32>
    %c0_12 = arith.constant 0 : index
    %c0_13 = arith.constant 0 : index
    %15 = vector.load %arg6[%c0_12, %c0_13] : memref<128x16xf32, #tpu.memory_space<vmem>>, vector<128x16xf32>
    %c0_14 = arith.constant 0 : index
    %c0_15 = arith.constant 0 : index
    %16 = vector.load %arg7[%c0_14, %c0_15] : memref<1x16xf32, #tpu.memory_space<vmem>>, vector<1x16xf32>
    %cst_16 = arith.constant dense<0.000000e+00> : vector<8x16xf32>
    %17 = tpu.matmul %14, %15, %cst_16 {dimension_numbers = #tpu.dot_dimension_numbers<[1], [0], [0], [1], [0, 0, 1, 1], [], []>} : vector<8x128xf32>, vector<128x16xf32>, vector<8x16xf32> -> vector<8x16xf32>
    %18 = vector.broadcast %16 : vector<1x16xf32> to vector<8x16xf32>
    %19 = arith.addf %17, %18 : vector<8x16xf32>
    %20 = arith.negf %19 : vector<8x16xf32>
    %21 = math.exp %20 : vector<8x16xf32>
    %cst_17 = arith.constant 1.000000e+00 : f32
    %22 = vector.broadcast %cst_17 : f32 to vector<8x16xf32>
    %23 = arith.addf %22, %21 : vector<8x16xf32>
    %24 = arith.divf %22, %23 : vector<8x16xf32>
    %c0_18 = arith.constant 0 : index
    %c0_19 = arith.constant 0 : index
    %25 = vector.load %arg8[%c0_18, %c0_19] : memref<8x16xf32, #tpu.memory_space<vmem>>, vector<8x16xf32>
    tpu.vector_store %arg8[%c0_18, %c0_19], %24 {strides = array<i32>} : memref<8x16xf32, #tpu.memory_space<vmem>>, vector<8x16xf32>,
    return
  }
  func.func @transform_0(%arg0: i32) -> (i32, i32) {
    %c0_i32 = arith.constant 0 : i32
    %c0_i32_0 = arith.constant 0 : i32
    return %arg0, %c0_i32 : i32, i32
  }
  func.func @transform_1(%arg0: i32) -> (i32, i32) {
    %c0_i32 = arith.constant 0 : i32
    %c0_i32_0 = arith.constant 0 : i32
    %c0_i32_1 = arith.constant 0 : i32
    return %c0_i32, %c0_i32_0 : i32, i32
  }
  func.func @transform_2(%arg0: i32) -> (i32, i32) {
    %c0_i32 = arith.constant 0 : i32
    %c0_i32_0 = arith.constant 0 : i32
    %c0_i32_1 = arith.constant 0 : i32
    return %c0_i32, %c0_i32_0 : i32, i32
  }
  func.func @transform_3(%arg0: i32) -> (i32, i32) {
    %c0_i32 = arith.constant 0 : i32
    %c0_i32_0 = arith.constant 0 : i32
    %c0_i32_1 = arith.constant 0 : i32
    return %c0_i32, %c0_i32_0 : i32, i32
  }
  func.func @transform_4(%arg0: i32) -> (i32, i32) {
    %c0_i32 = arith.constant 0 : i32
    %c0_i32_0 = arith.constant 0 : i32
    %c0_i32_1 = arith.constant 0 : i32
    return %c0_i32, %c0_i32_0 : i32, i32
  }
  func.func @transform_5(%arg0: i32) -> (i32, i32) {
    %c0_i32 = arith.constant 0 : i32
    %c0_i32_0 = arith.constant 0 : i32
    %c0_i32_1 = arith.constant 0 : i32
    return %c0_i32, %c0_i32_0 : i32, i32
  }
  func.func @transform_6(%arg0: i32) -> (i32, i32) {
    %c0_i32 = arith.constant 0 : i32
    %c0_i32_0 = arith.constant 0 : i32
    %c0_i32_1 = arith.constant 0 : i32
    return %c0_i32, %c0_i32_0 : i32, i32
  }
  func.func @transform_7(%arg0: i32) -> (i32, i32) {
    %c0_i32 = arith.constant 0 : i32
    %c0_i32_0 = arith.constant 0 : i32
    return %arg0, %c0_i32 : i32, i32
  }
}

</mosaic_0001>

<bundles_post_ra>
// kernel: tpu_custom_call.1
= control target key start
LH: loop header
LB: loop body
LE: loop exit
PB: predicated region body
PF: predicated region fallthrough
CT: control target
= control target key end

     0   :  { %12 = vsyncpa [#allocation3], 0  ;;  %s928_s0 = inlined_call_operand.vmem [shape: f32[16,32], index: 0, kind: input, shape index: {}]   ;;  %s929_s1 = inlined_call_operand.hbm [shape: f32[32,128], index: 1, kind: input, shape index: {}]   ;;  %s930_s2 = inlined_call_operand.vmem [shape: f32[1,128], index: 2, kind: input, shape index: {}]   ;;  %s931_s3 = inlined_call_operand.vmem [shape: f32[128,128], index: 3, kind: input, shape index: {}]   ;;  %s932_s4 = inlined_call_operand.vmem [shape: f32[1,128], index: 4, kind: input, shape index: {}]   ;;  %s933_s5 = inlined_call_operand.vmem [shape: f32[128,16], index: 5, kind: input, shape index: {}]   ;;  %s934_s6 = inlined_call_operand.vmem [shape: f32[1,16], index: 6, kind: input, shape index: {}]   ;;  %s935_s7 = inlined_call_operand.hbm [shape: f32[16,16], index: 7, kind: output, shape index: {}]  }
   0x1   :  { %13 = vsyncpa [#allocation4], 0 }
   0x2   :  { %15 = vsyncpa [#allocation4 + $0x1], 0  ;;  %s728_s24 = smov 0   ;;  %s730_s25 = smov 0  }
   0x3   :  { %s732_s26 = smov 0   ;;  %s734_s27 = smov 0  }
   0x4 LB: > { %s749_s28 = sadd.s32 4294967295, %s683_s27   ;;  %s514_s29 = sadd.s32 4294967294, %s683_s27   ;;  %s683_s27 = sphi %s734_s27, %s941_s27   ;;  %s679_s26 = sphi %s732_s26, %s940_s26   ;;  %s675_s25 = sphi %s730_s25, %s939_s25   ;;  %s671_s24 = sphi %s728_s24, %s938_s24  }
   0x5   : > { %s753_s30 = sadd.s32 1, %s683_s27   ;;  %s180_s8 = sadd.s32 1, %s679_s26 }
   0x6   : > { %s177_s9 = ssub.s32 %s683_s27, %s753_s30  ;;  %p190_p0 = scmp.ne.s32.totalorder %s679_s26, %s675_s25 }
   0x7   : > { %p178_p1 = scmp.eq.s32.totalorder %s177_s9, 0  ;;  %p191_p2 = scmp.eq.s32.totalorder %s749_s28, 1 }
   0x8   : > { %p196_p3 = scmp.ne.s32.totalorder %s675_s25, %s671_s24  ;;  %p197_p4 = scmp.eq.s32.totalorder %s514_s29, 1 }
   0x9   : > { %s764_s10 = scalar_select %p178_p1, %s679_s26, %s180_s8  }
   0xa   : > { %p766_p5 = por %p191_p2, %p190_p0  ;;  %p770_p6 = por %p197_p4, %p196_p3 }
   0xb   : > { %p515_p7 = scmp.ge.s32.totalorder %s683_s27, 1  ;;  %p204_p8 = scmp.lt.s32.totalorder %s683_s27, 3 }
   0xc   : > { %p542_p9 = scmp.eq.s32.totalorder %s749_s28, 0  ;;  %s215_s15 = sshll.u32 %s929_s1, 4  ;;  %s216_s15 = int_to_ptr.hbm [resolvable:$true] %s215_s15 }
   0xd   : > { %p205_p10 = pnand %p515_p7, %p204_p8  ;;  %s685_s16 = smov [#allocation2]  }
   0xe   : > { %s217_s17 = sshll.u32 %s685_s16, 4  ;;  %s686_s18 = smov 128   ;;  %s218_s17 = int_to_ptr.vmem [resolvable:$true] %s217_s17 }
   0xf   : > { %p534_p11 = pneg %p205_p10  ;;  %s687_s19 = smov 8  }
  0x10   : > { %255 = sbr.rel (%p205_p10) target bundleno = 455 (0x1c7), region = 48 }
  0x11   : > { %p535_p12 = pnand %p542_p9, %p534_p11 }
  0x13   : > { %537 = dma.hbm_to_vmem [thread:$0]  (!%p535_p12), %s216_s15, 512, %s218_s17, [#allocation3], %s686_s18, %s686_s18, %s687_s19  }
  0x15   : > { %662 = dma.done.wait (%p542_p9), [#allocation3], 512  }
  0x16   : > { %664 = vsyncadd (%p542_p9), [#allocation3], 4294966784  ;;  %p287_p13 = scmp.lt.s32.totalorder %s749_s28, 1  ;;  %v295_v0 = vld [vmem:[#allocation2 + $0x18] sm:$0xff]  ;;  %v294_v1 = vld [vmem:[#allocation2 + $0x10] sm:$0xff]  ;;  %vm300_vm0 = vcmask 261120  }
  0x17   : > { %316 = vmatpush.msra.mxu0 %v295_v0  ;;  %v340_v2 = vld [vmem:[%s931_s3 + $0x78] sm:$0xff]  ;;  %v293_v3 = vld [vmem:[#allocation2 + $0x8] sm:$0xff]  ;;  %v339_v4 = vld [vmem:[%s931_s3 + $0x70] sm:$0xff]  ;;  %s284_s8 = sand.u32 1, %s675_s25   ;;  %s525_s13 = sshll.u32 %s749_s28, 3  ;;  %vm425_vm4 = vcmask 130048  }
  0x18   : > { %s288_s20 = scalar_select %p287_p13, %s749_s28, 1  ;;  %345 = vmatpush.msra.mxu1 %v340_v2  ;;  %v338_v5 = vld [vmem:[%s931_s3 + $0x68] sm:$0xff]  ;;  %v292_v6 = vld [vmem:[#allocation2] sm:$0xff]  ;;  %v336_v9 = vld [vmem:[%s931_s3 + $0x58] sm:$0xff] }
  0x19   : > { %317 = vmatpush.msra.mxu0 %v294_v1  ;;  %v337_v8 = vld [vmem:[%s931_s3 + $0x60] sm:$0xff]  ;;  %v335_v10 = vld [vmem:[%s931_s3 + $0x50] sm:$0xff]  ;;  %v334_v11 = vld [vmem:[%s931_s3 + $0x48] sm:$0xff]  ;;  %s438_s16 = scalar_lea.hbm %s935_s7, %s525_s13  ;;  %s428_s28 = scalar_lea.sflag [#allocation4], %s284_s8 }
  0x1a   : > { %s521_s21 = sshll.u32 %s288_s20, 3  ;;  %346 = vmatpush.msra.mxu1 %v339_v4  ;;  %v333_v12 = vld [vmem:[%s931_s3 + $0x40] sm:$0xff]  ;;  %v332_v13 = vld [vmem:[%s931_s3 + $0x38] sm:$0xff]  ;;  %v331_v14 = vld [vmem:[%s931_s3 + $0x30] sm:$0xff]  ;;  %s442_s19 = sshll.u32 %s438_s16, 4  ;;  %s443_s19 = int_to_ptr.hbm [resolvable:$true] %s442_s19 }
  0x1b   : > { %s290_s9 = scalar_lea.vmem %s928_s0, %s521_s21  ;;  %318 = vmatpush.msra.mxu0 %v293_v3  ;;  %v330_v15 = vld [vmem:[%s931_s3 + $0x28] sm:$0xff]  ;;  %v329_v16 = vld [vmem:[%s931_s3 + $0x20] sm:$0xff]  ;;  %v328_v17 = vld [vmem:[%s931_s3 + $0x18] sm:$0xff]  ;;  %s631_s20 = sshra.s32 %s443_s19, 4  ;;  %s632_s20 = int_to_ptr.hbm [resolvable:$true] %s631_s20 }
  0x1c   : > { %v291_v7 = vld [vmem:[%s290_s9] sm:$0xff]  ;;  %347 = vmatpush.msra.mxu1 %v338_v5  ;;  %v327_v18 = vld [vmem:[%s931_s3 + $0x10] sm:$0xff]  ;;  %v326_v19 = vld [vmem:[%s931_s3 + $0x8] sm:$0xff]  ;;  %s520_s9 = sshll.u32 %s284_s8, 3  ;;  %s633_s21 = scalar_lea.hbm %s632_s20, 8 }
  0x1d   : > { %319 = vmatpush.msra.mxu0 %v292_v6  ;;  %v325_v20 = vld [vmem:[%s931_s3] sm:$0xff]  ;;  %v381_v21 = vld [vmem:[%s933_s5 + $0x78] sm:$0xff]  ;;  %v380_v22 = vld [vmem:[%s933_s5 + $0x70] sm:$0xff]  ;;  %s286_s17 = scalar_lea.vmem [#allocation5], %s520_s9  ;;  %p634_p0 = scmp.ne.s32.totalorder %s632_s20, %s633_s21 }
  0x1e   : > { %522 = vmatmul.msk.f32.vlgmr.msra.gmra.mxu0 %vm300_vm0, %v291_v7  ;;  %348 = vmatpush.msra.mxu1 %v337_v8  ;;  %v379_v23 = vld [vmem:[%s933_s5 + $0x68] sm:$0xff]  ;;  %v378_v24 = vld [vmem:[%s933_s5 + $0x60] sm:$0xff]  ;;  %v377_v25 = vld [vmem:[%s933_s5 + $0x58] sm:$0xff]  ;;  %s440_s18 = sshll.u32 %s286_s17, 4  ;;  %s637_s29 = scalar_lea.hbm %s935_s7, 16  ;;  %s441_s18 = int_to_ptr.vmem [resolvable:$true] %s440_s18 }
  0x1f   : > { %386 = vmatpush.msra.mxu2 %v381_v21  ;;  %v376_v26 = vld [vmem:[%s933_s5 + $0x50] sm:$0xff]  ;;  %v375_v27 = vld [vmem:[%s933_s5 + $0x48] sm:$0xff]  ;;  %v374_v28 = vld [vmem:[%s933_s5 + $0x40] sm:$0xff]  ;;  %p635_p1 = pnand %p634_p0, %p766_p5  ;;  %p638_p3 = scmp.lt.s32.totalorder %s632_s20, %s935_s7 }
  0x20   : > { %349 = vmatpush.msra.mxu1 %v336_v9  ;;  %v373_v29 = vld [vmem:[%s933_s5 + $0x38] sm:$0xff]  ;;  %v372_v30 = vld [vmem:[%s933_s5 + $0x30] sm:$0xff]  ;;  %v371_v31 = vld [vmem:[%s933_s5 + $0x28] sm:$0xff]  ;;  %p639_p4 = scmp.lt.s32.totalorder %s637_s29, %s633_s21 }
  0x21   : > { %387 = vmatpush.msra.mxu2 %v380_v22  ;;  %v370_v32 = vld [vmem:[%s933_s5 + $0x20] sm:$0xff]  ;;  %v369_v33 = vld [vmem:[%s933_s5 + $0x18] sm:$0xff]  ;;  %v368_v38 = vld [vmem:[%s933_s5 + $0x10] sm:$0xff]  ;;  %p636_p2 = pneg %p635_p1 }
  0x22   : > { %350 = vmatpush.msra.mxu1 %v335_v10  ;;  %v580_v34 = vld [vmem:[%s930_s2] ss:$0 sm:$0xff]  ;;  %v367_v39 = vld [vmem:[%s933_s5 + $0x8] sm:$0xff]  ;;  %p640_p7 = por %p639_p4, %p638_p3 }
  0x23   : > { %388 = vmatpush.msra.mxu2 %v379_v23  ;;  %v366_v40 = vld [vmem:[%s933_s5] sm:$0xff] }
  0x24   : > { %351 = vmatpush.msra.mxu1 %v334_v11  ;;  %v581_v41 = vld [vmem:[%s932_s4] ss:$0 sm:$0xff]  ;;  %p641_p8 = pnand %p640_p7, %p636_p2 }
  0x25   : > { %389 = vmatpush.msra.mxu2 %v378_v24  ;;  %v582_v45 = vld [vmem:[%s934_s6] ss:$0 sm:$0xff] }
  0x26   : > { %352 = vmatpush.msra.mxu1 %v333_v12 }
  0x27   : > { %390 = vmatpush.msra.mxu2 %v377_v25 }
  0x28   : > { %353 = vmatpush.msra.mxu1 %v332_v13 }
  0x29   : > { %391 = vmatpush.msra.mxu2 %v376_v26 }
  0x2a   : > { %354 = vmatpush.msra.mxu1 %v331_v14 }
  0x2b   : > { %392 = vmatpush.msra.mxu2 %v375_v27 }
  0x2c   : > { %355 = vmatpush.msra.mxu1 %v330_v15 }
  0x2d   : > { %393 = vmatpush.msra.mxu2 %v374_v28 }
  0x2e   : > { %356 = vmatpush.msra.mxu1 %v329_v16 }
  0x2f   : > { %394 = vmatpush.msra.mxu2 %v373_v29 }
  0x30   : > { %357 = vmatpush.msra.mxu1 %v328_v17 }
  0x31   : > { %395 = vmatpush.msra.mxu2 %v372_v30 }
  0x32   : > { %358 = vmatpush.msra.mxu1 %v327_v18 }
  0x33   : > { %396 = vmatpush.msra.mxu2 %v371_v31 }
  0x34   : > { %359 = vmatpush.msra.mxu1 %v326_v19 }
  0x35   : > { %397 = vmatpush.msra.mxu2 %v370_v32 }
  0x36   : > { %360 = vmatpush.msra.mxu1 %v325_v20 }
  0x37   : > { %398 = vmatpush.msra.mxu2 %v369_v33 }
  0x39   : > { %399 = vmatpush.msra.mxu2 %v368_v38 }
  0x3b   : > { %400 = vmatpush.msra.mxu2 %v367_v39 }
  0x3d   : > { %401 = vmatpush.msra.mxu2 %v366_v40 }
  0x9b   : > { %v321_v35 = vpop.f32.mrf.mxu0 }
  0x9c   : > { %v322_v36 = vadd.f32 %v580_v34, %v321_v35 }
  0x9e   : > { %v324_v37 = vmax.f32 %v322_v36, 0.0 }
  0xa0   : > { %361 = vmatmul.f32.vlgmr.msra.gmra.mxu1 %v324_v37 }
 0x11d   : > { %v362_v42 = vpop.f32.mrf.mxu1 }
 0x11e   : > { %v363_v43 = vadd.f32 %v581_v41, %v362_v42 }
 0x120   : > { %v365_v44 = vmax.f32 %v363_v43, 0.0 }
 0x122   : > { %402 = vmatmul.f32.vlgmr.msra.gmra.mxu2 %v365_v44 }
 0x1a5   : > { %v403_v46 = vpop.f32.mrf.mxu2 }
 0x1a6   : > { %v404_v47 = vadd.f32 %v582_v45, %v403_v46 }
 0x1a8   : > { %v523_v48 = vmul.f32 -1.442695, %v404_v47 }
 0x1aa   : > { %583 = vpow2.f32 %v523_v48 }
 0x1b0   : > { %v584_v49 = vpop.eup %583 }
 0x1b1   : > { %v409_v50 = vadd.f32 1.0, %v584_v49 }
 0x1b3   : > { %585 = vrcp.f32 %v409_v50  ;;  %v421_v54 = vand.u32 2147483648, %v409_v50  ;;  %v419_v56 = vand.u32 2147483647, %v409_v50  ;;  %vm415_vm2 = vweird.f32 %v409_v50 }
 0x1b5   : > { %v422_v58 = vor.u32 1.1754944e-38, %v421_v54  ;;  %vm420_vm5 = vcmp.eq.f32.partialorder %v419_v56, 8.507059e+37 }
 0x1b9   : > { %v586_v51 = vpop.eup %585 }
 0x1ba   : > { %v411_v52 = vmul.f32 %v586_v51, %v409_v50  ;;  %vm416_vm1 = vweird.f32 %v586_v51 }
 0x1bb   : > { %vm417_vm3 = vmor %vm415_vm2, %vm416_vm1 }
 0x1bc   : > { %v412_v53 = vsub.f32 1.0, %v411_v52 }
 0x1be   : > { %v413_v55 = vmul.f32 %v586_v51, %v412_v53 }
 0x1c0   : > { %v414_v57 = vadd.f32 %v586_v51, %v413_v55 }
 0x1c2   : > { %v418_v59 = vsel %vm417_vm3, %v586_v51, %v414_v57 }
 0x1c3   : > { %v423_v60 = vsel %vm420_vm5, %v422_v58, %v418_v59 }
 0x1c4   : > { %426 = vst.msk [vmem:[%s286_s17] sm:$0xff] %vm425_vm4, %v423_v60 }
 0x1c5   : > { %644 = shalt.err (!%p641_p8)
}
 0x1c6   : > { %532 = dma.vmem_to_hbm [thread:$0]  (%p766_p5), %s441_s18, 128, %s443_s19, %s428_s28  }
 0x1c7 PF: > { %p544_p9 = scmp.ge.s32.totalorder %s683_s27, 2  ;;  %s454_s8 = sand.u32 1, %s671_s24  }
 0x1c8   : > { %s455_s14 = scalar_lea.sflag [#allocation4], %s454_s8 }
 0x1c9   : > { %p539_p10 = pnand %p544_p9, %p770_p6 }
 0x1cb   : > { %p540_p11 = pneg %p539_p10 }
 0x1cd   : > { %666 = dma.done.wait (%p540_p11), %s455_s14, 128  }
 0x1ce   : > { %668 = vsyncadd (%p540_p11), %s455_s14, 4294967168  ;;  %p18_p12 = scmp.ge.s32.totalorder %s753_s30, 4   ;;  %s938_s24 = smov %s675_s25 }
 0x1cf   : > { %s939_s25 = smov %s679_s26  ;;  %s940_s26 = smov %s764_s10 }
 0x1d0   : > { %s941_s27 = smov %s753_s30  ;;  %20 = sbr.rel (!%p18_p12) target bundleno = 4 (0x4), region = 88 }
 0x1d5   :  { %461 = vsyncpa [#allocation3], 1 }
 0x1d6   :  { %463 = vsyncpa [#allocation3 + $0x1], 1 }
 0x1d7   :  { %464 = vsyncpa [#allocation4], 1 }
 0x1d8   :  { %466 = vsyncpa [#allocation4 + $0x1], 1 }

</bundles_post_ra>
